<compile_context>
chip_gen: v7x
topology: tpu7x:2x2x1
jax: 0.10.0
libtpu: 0.0.40
codegen_flags: <defaults>
</compile_context>

<pallas_src>
import math

import jax
import jax.numpy as jnp
from jax.experimental import pallas as pl
from jax.experimental.pallas import tpu as pltpu

_TARGET_TILE_BYTES = 4 << 20   # ~4 MiB per block buffer (amortizes per-step overhead)
_FALLBACK_LANES = 128          # minimal lane-dense width when padding is unavoidable


def _sigmoid_poly_kernel(x_ref, o_ref):
    x = x_ref[...]
    # Native compute for f32 and bf16 (bf16 VPU on v6e/v7x keeps vregs packed);
    # other dtypes round-trip through f32 for accuracy.
    if x.dtype == jnp.float32 or x.dtype == jnp.bfloat16:
        xc = x
    else:
        xc = x.astype(jnp.float32)
    # Horner form of 0.5 + 0.197*x - 0.004*x^3.
    y = 0.5 + xc * (0.197 - 0.004 * (xc * xc))
    o_ref[...] = y.astype(o_ref.dtype)


def sigmoid_poly(x):
    """Elementwise cubic sigmoid approximation via a tiled Pallas TPU kernel.

    Accepts any-rank input (e.g. NCHW); flattens to a lane-dense (rows, lanes)
    slab, processes it with a pipelined 1-D grid of ~4 MiB tiles, and restores
    the original shape afterwards.
    """
    orig_shape = x.shape
    total = int(math.prod(orig_shape)) if orig_shape else 1
    itemsize = jnp.dtype(x.dtype).itemsize

    flat = x.reshape(-1)

    # Pick a lane-dense minor dim (multiple of 128) that divides the element
    # count exactly, so no wrapper-side jnp.pad / tail-slice (each a full HBM
    # read+write) is needed.
    lanes = None
    for cand in (512, 256, 128):
        if total % cand == 0:
            lanes = cand
            break

    pad = 0
    if lanes is None:
        # TODO(synk): a <128-element remainder still forces one pad + slice
        # round-trip; avoid only via manual DMA with masked tail handling.
        lanes = _FALLBACK_LANES
        rows = -(-total // lanes)          # ceil div
        pad = rows * lanes - total
        flat = jnp.pad(flat, (0, pad))
    else:
        rows = total // lanes

    # Tile rows so each block buffer is ~4 MiB; keep a multiple of 8 (sublane).
    tile_r = max(8, (_TARGET_TILE_BYTES // (lanes * itemsize)) // 8 * 8)
    if rows <= tile_r:
        # Small input: single block covering all rows (block dim equals the
        # full array dim, so the (8,128) divisibility rule is satisfied).
        tile_r = rows

    x2d = flat.reshape(rows, lanes)
    # Partial last block (rows not a multiple of tile_r) is masked by Pallas;
    # no row padding required.
    grid = (pl.cdiv(rows, tile_r),)

    tile_bytes = tile_r * lanes * itemsize
    # 2 operands x 2 pipeline buffers x tile + headroom; never request the
    # whole physical VMEM (v7x only has 64 MiB).
    vmem_limit = int(min(32 << 20, 4 * tile_bytes + (8 << 20)))

    out2d = pl.pallas_call(
        _sigmoid_poly_kernel,
        out_shape=jax.ShapeDtypeStruct((rows, lanes), x.dtype),
        grid_spec=pl.GridSpec(
            grid=grid,
            in_specs=[pl.BlockSpec((tile_r, lanes), lambda i: (i, 0))],
            out_specs=pl.BlockSpec((tile_r, lanes), lambda i: (i, 0)),
        ),
        compiler_params=pltpu.CompilerParams(
            # Elementwise map, no cross-tile dependence.  (CORE_PARALLEL on
            # v7x could shard the loop across both TCs but both share HBM BW;
            # plain "parallel" is safe on all generations.)
            dimension_semantics=("parallel",),
            vmem_limit_bytes=vmem_limit,
        ),
        cost_estimate=pl.CostEstimate(
            flops=5 * total,
            transcendentals=0,
            bytes_accessed=2 * total * itemsize,
        ),
    )(x2d)

    out_flat = out2d.reshape(-1)
    if pad:
        out_flat = out_flat[:total]
    return out_flat.reshape(orig_shape)


if __name__ == "__main__":
    key = jax.random.PRNGKey(0)

    # Small NCHW input consistent with a conv-style module: (2, 4, 16, 16)
    x = jax.random.normal(key, (2, 4, 16, 16), dtype=jnp.float32)
    y = jax.block_until_ready(sigmoid_poly(x))
    ref = 0.5 + 0.197 * x - 0.004 * (x ** 3)
    assert y.shape == x.shape and y.dtype == x.dtype
    assert jnp.allclose(y, ref, atol=1e-5, rtol=1e-5)

    # Also exercise the non-lane-aligned fallback path (105 elements).
    x2 = jax.random.normal(jax.random.PRNGKey(1), (3, 5, 7), dtype=jnp.float32)
    y2 = jax.block_until_ready(sigmoid_poly(x2))
    ref2 = 0.5 + 0.197 * x2 - 0.004 * (x2 ** 3)
    assert y2.shape == x2.shape and jnp.allclose(y2, ref2, atol=1e-5, rtol=1e-5)

    print("KERNEL_OK")
</pallas_src>

<mosaic_0001>
module attributes {stable_mosaic.version = 11 : i64} {
  func.func @_sigmoid_poly_kernel(%arg0: i32, %arg1: memref<4x512xf32, #tpu.memory_space<vmem>>, %arg2: memref<4x512xf32, #tpu.memory_space<vmem>>) attributes {dimension_semantics = [#tpu.dimension_semantics<parallel>], iteration_bounds = array<i64: 1>, scalar_prefetch = 0 : i64, scratch_operands = 0 : i64, tpu.core_type = #tpu.core_type<tc>, window_params = [{transform_indices = @transform_0, window_bounds = array<i64: 4, 512>}, {transform_indices = @transform_1, window_bounds = array<i64: 4, 512>}]} {
    %c0 = arith.constant 0 : index
    %c0_0 = arith.constant 0 : index
    %0 = vector.load %arg1[%c0, %c0_0] : memref<4x512xf32, #tpu.memory_space<vmem>>, vector<4x512xf32>
    %1 = arith.mulf %0, %0 : vector<4x512xf32>
    %cst = arith.constant 4.000000e-03 : f32
    %2 = vector.broadcast %cst : f32 to vector<4x512xf32>
    %3 = arith.mulf %2, %1 : vector<4x512xf32>
    %cst_1 = arith.constant 1.970000e-01 : f32
    %4 = vector.broadcast %cst_1 : f32 to vector<4x512xf32>
    %5 = arith.subf %4, %3 : vector<4x512xf32>
    %6 = arith.mulf %0, %5 : vector<4x512xf32>
    %cst_2 = arith.constant 5.000000e-01 : f32
    %7 = vector.broadcast %cst_2 : f32 to vector<4x512xf32>
    %8 = arith.addf %7, %6 : vector<4x512xf32>
    %c0_3 = arith.constant 0 : index
    %c0_4 = arith.constant 0 : index
    %9 = vector.load %arg2[%c0_3, %c0_4] : memref<4x512xf32, #tpu.memory_space<vmem>>, vector<4x512xf32>
    tpu.vector_store %arg2[%c0_3, %c0_4], %8 {strides = array<i32>} : memref<4x512xf32, #tpu.memory_space<vmem>>, vector<4x512xf32>,
    return
  }
  func.func @transform_0(%arg0: i32) -> (i32, i32) {
    %c0_i32 = arith.constant 0 : i32
    %c0_i32_0 = arith.constant 0 : i32
    return %arg0, %c0_i32 : i32, i32
  }
  func.func @transform_1(%arg0: i32) -> (i32, i32) {
    %c0_i32 = arith.constant 0 : i32
    %c0_i32_0 = arith.constant 0 : i32
    return %arg0, %c0_i32 : i32, i32
  }
}

</mosaic_0001>

<bundles_post_ra>
// kernel: tpu_custom_call.1
= control target key start
LH: loop header
LB: loop body
LE: loop exit
PB: predicated region body
PF: predicated region fallthrough
CT: control target
= control target key end

     0   :  { %6 = vsyncpa [#allocation3], 0  ;;  %s136_s0 = inlined_call_operand.hbm [shape: f32[4,512], index: 0, kind: input, shape index: {}]   ;;  %s137_s1 = inlined_call_operand.hbm [shape: f32[4,512], index: 1, kind: output, shape index: {}]  }
   0x1   :  { %7 = vsyncpa [#allocation4], 0  ;;  %s100_s6 = smov [#allocation2]   ;;  %s52_s10 = scalar_lea.hbm %s136_s0, 256 }
   0x2   :  { %s14_s7 = sshll.u32 %s100_s6, 4  ;;  %p53_p0 = scmp.ne.s32.totalorder %s136_s0, %s52_s10  ;;  %s15_s7 = int_to_ptr.vmem [resolvable:$true] %s14_s7 }
   0x3   :  { %p56_p1 = scmp.lt.u32.totalorder %s52_s10, %s136_s0 }
   0x5   :  { %p58_p2 = pnand %p56_p1, %p53_p0 }
   0x7   :  { %61 = shalt.err (!%p58_p2)
}
   0x8   :  { %s62_s15 = scalar_lea.vmem %s15_s7, 256  ;;  %p67_p4 = scmp.lt.s32.totalorder %s15_s7, %s15_s7 }
   0x9   :  { %p63_p3 = scmp.ne.s32.totalorder %s15_s7, %s62_s15  ;;  %p68_p5 = scmp.lt.s32.totalorder %s62_s15, %s62_s15 }
   0xb   :  { %p69_p6 = por %p68_p5, %p67_p4 }
   0xd   :  { %p70_p7 = pnand %p69_p6, %p63_p3 }
   0xf   :  { %73 = shalt.err (!%p70_p7)
}
  0x10   :  { %17 = dma.hbm_to_vmem [thread:$0]  %s136_s0, 256, %s15_s7, [#allocation3]  }
  0x11   :  { %96 = dma.done.wait [#allocation3], 256  }
  0x12   :  { %97 = vsyncadd [#allocation3], 4294967040  ;;  %v21_v0 = vld [vmem:[#allocation2] sm:$0xff]  ;;  %v22_v1 = vld [vmem:[#allocation2 + $0x8] sm:$0xff]  ;;  %s101_s18 = smov [#allocation5]  }
  0x13   :  { %v23_v2 = vmul.f32 %v21_v0, %v21_v0  ;;  %v24_v3 = vmul.f32 %v22_v1, %v22_v1  ;;  %s41_s19 = sshll.u32 %s101_s18, 4  ;;  %s42_s19 = int_to_ptr.vmem [resolvable:$true] %s41_s19 }
  0x14   :  { %s74_s0 = scalar_lea.vmem %s42_s19, 256  ;;  %p79_p9 = scmp.lt.s32.totalorder %s42_s19, %s42_s19 }
  0x15   :  { %v25_v4 = vmul.f32 0.004, %v23_v2  ;;  %v26_v5 = vmul.f32 0.004, %v24_v3  ;;  %p75_p8 = scmp.ne.s32.totalorder %s42_s19, %s74_s0  ;;  %p80_p10 = scmp.lt.s32.totalorder %s74_s0, %s74_s0 }
  0x17   :  { %v27_v6 = vsub.f32 0.197, %v25_v4  ;;  %v28_v7 = vsub.f32 0.197, %v26_v5  ;;  %p81_p11 = por %p80_p10, %p79_p9 }
  0x19   :  { %v29_v8 = vmul.f32 %v27_v6, %v21_v0  ;;  %v30_v9 = vmul.f32 %v28_v7, %v22_v1  ;;  %p82_p12 = pnand %p81_p11, %p75_p8 }
  0x1b   :  { %v31_v10 = vadd.f32 0.5, %v29_v8  ;;  %v32_v11 = vadd.f32 0.5, %v30_v9 }
  0x1d   :  { %33 = vst [vmem:[#allocation5] sm:$0xff] %v31_v10  ;;  %34 = vst [vmem:[#allocation5 + $0x8] sm:$0xff] %v32_v11 }
  0x1e   :  { %85 = shalt.err (!%p82_p12)
}
  0x1f   :  { %s86_s22 = scalar_lea.hbm %s137_s1, 256 }
  0x20   :  { %p87_p13 = scmp.ne.s32.totalorder %s137_s1, %s86_s22  ;;  %p90_p0 = scmp.lt.u32.totalorder %s86_s22, %s137_s1 }
  0x22   :  { %p92_p1 = pnand %p90_p0, %p87_p13 }
  0x24   :  { %95 = shalt.err (!%p92_p1)
}
  0x25   :  { %44 = dma.vmem_to_hbm [thread:$0]  %s42_s19, 256, %s137_s1, [#allocation4]  }
  0x26   :  { %98 = dma.done.wait [#allocation4], 256  }
  0x27   :  { %99 = vsyncadd [#allocation4], 4294967040 }
  0x28   :  { %48 = vsyncpa [#allocation3], 1 }
  0x29   :  { %49 = vsyncpa [#allocation4], 1 }

</bundles_post_ra>
